<compile_context>
chip_gen: v5e
topology: v5e:2x2
jax: 0.10.0
libtpu: 0.0.40
codegen_flags: <defaults>
</compile_context>

<pallas_src>
import functools

import jax
import jax.numpy as jnp
from jax.experimental import pallas as pl
from jax.experimental.pallas import tpu as pltpu

_SUBLANE = 8


def _round_up(v, m):
    return (v + m - 1) // m * m


def _cdiv(a, b):
    return -(-a // b)


def _mlp_kernel(x_ref, w1_ref, b1_ref, w2_ref, b2_ref, w3_ref, b3_ref, o_ref,
                *, apply_sigmoid):
    # In-kernel f32 -> bf16 cast of the activations (kernel is HBM-bound, the
    # VPU cast is free); f32 accumulation on the MXU throughout.
    x = x_ref[...].astype(w1_ref.dtype)

    # fc1 + ReLU
    h1 = jnp.dot(x, w1_ref[...], preferred_element_type=jnp.float32) + b1_ref[...]
    h1 = jnp.maximum(h1, 0.0).astype(w2_ref.dtype)

    # fc2 + ReLU
    h2 = jnp.dot(h1, w2_ref[...], preferred_element_type=jnp.float32) + b2_ref[...]
    h2 = jnp.maximum(h2, 0.0).astype(w3_ref.dtype)

    # fc3 (raw logits; optional fused sigmoid for inference)
    out = jnp.dot(h2, w3_ref[...], preferred_element_type=jnp.float32) + b3_ref[...]
    if apply_sigmoid:
        out = jax.nn.sigmoid(out)
    o_ref[...] = out.astype(o_ref.dtype)


def multilabel_mlp_forward(x, params, *, batch_tile=2048, apply_sigmoid=False,
                           compute_dtype=jnp.bfloat16):
    """x: (B, input_size) float32.  params: dict of transposed weights/biases.

    Returns raw logits (B, num_classes) in float32 (sigmoid applied only if
    apply_sigmoid=True).
    """
    w1, b1 = params["w1"], params["b1"]   # (in, 128), (1, 128)
    w2, b2 = params["w2"], params["b2"]   # (128, 64), (1, 64)
    w3, b3 = params["w3"], params["b3"]   # (64, C),   (1, C)

    B, in_dim = x.shape
    h1_dim = w1.shape[1]
    h2_dim = w2.shape[1]
    num_classes = w3.shape[1]

    # ---- Batch tiling (no batch padding; last tile relies on edge-block
    # handling: OOB reads are garbage rows, OOB writes are dropped).
    batch_tile = max(_SUBLANE, _round_up(batch_tile, _SUBLANE))
    steps = _cdiv(B, batch_tile)
    if B >= 128:
        # Ensure >=4 grid steps for large batches so the parallel axis shards
        # across both TensorCores on v7x and the DMA pipeline has depth.
        steps = max(steps, 4)
    if steps == 1:
        bt = B                                   # single full-extent block
    else:
        bt = _round_up(_cdiv(B, steps), _SUBLANE)  # balanced, sublane-aligned
        steps = _cdiv(B, bt)
    grid = (steps,)

    # ---- Tiny one-time weight/bias casts (fused into the jitted graph).
    w1c = w1.astype(compute_dtype)
    w2c = w2.astype(compute_dtype)
    w3c = w3.astype(compute_dtype)
    b1c = b1.reshape(1, h1_dim).astype(jnp.float32)
    b2c = b2.reshape(1, h2_dim).astype(jnp.float32)
    b3c = b3.reshape(1, num_classes).astype(jnp.float32)

    # ---- Advisory cost estimate for the outer XLA scheduler.
    w_itemsize = jnp.dtype(compute_dtype).itemsize
    flops = 2 * B * (in_dim * h1_dim + h1_dim * h2_dim + h2_dim * num_classes)
    bytes_accessed = (
        B * in_dim * 4                                               # x (f32)
        + (in_dim * h1_dim + h1_dim * h2_dim + h2_dim * num_classes) * w_itemsize
        + (h1_dim + h2_dim + num_classes) * 4                        # f32 biases
        + B * num_classes * 4                                        # f32 output
    )
    cost = pl.CostEstimate(
        flops=flops,
        transcendentals=(B * num_classes) if apply_sigmoid else 0,
        bytes_accessed=bytes_accessed,
    )

    # Constant-index weight/bias blocks: DMA'd once, resident across the grid.
    def const_spec(arr):
        return pl.BlockSpec(arr.shape, lambda i: (0, 0))

    out = pl.pallas_call(
        functools.partial(_mlp_kernel, apply_sigmoid=apply_sigmoid),
        out_shape=jax.ShapeDtypeStruct((B, num_classes), jnp.float32),
        grid_spec=pltpu.PrefetchScalarGridSpec(
            num_scalar_prefetch=0,
            grid=grid,
            in_specs=[
                pl.BlockSpec((bt, in_dim), lambda i: (i, 0)),   # x batch tile (f32)
                const_spec(w1c),
                const_spec(b1c),
                const_spec(w2c),
                const_spec(b2c),
                const_spec(w3c),
                const_spec(b3c),
            ],
            out_specs=pl.BlockSpec((bt, num_classes), lambda i: (i, 0)),
        ),
        compiler_params=pltpu.CompilerParams(
            dimension_semantics=("parallel",),
            vmem_limit_bytes=32 * 1024 * 1024,
        ),
        cost_estimate=cost,
    )(x, w1c, b1c, w2c, b2c, w3c, b3c)

    return out


def init_params(key, input_size, num_classes):
    """Deterministic synthetic parameters (shapes match the PyTorch module,
    weights stored transposed as (in_features, out_features))."""
    k1, k2, k3, k4, k5, k6 = jax.random.split(key, 6)
    w1 = jax.random.normal(k1, (input_size, 128), jnp.float32) * 0.05
    b1 = jax.random.normal(k2, (1, 128), jnp.float32) * 0.05
    w2 = jax.random.normal(k3, (128, 64), jnp.float32) * 0.05
    b2 = jax.random.normal(k4, (1, 64), jnp.float32) * 0.05
    w3 = jax.random.normal(k5, (64, num_classes), jnp.float32) * 0.05
    b3 = jax.random.normal(k6, (1, num_classes), jnp.float32) * 0.05
    return {"w1": w1, "b1": b1, "w2": w2, "b2": b2, "w3": w3, "b3": b3}


def reference_forward(x, params):
    h1 = jnp.maximum(x @ params["w1"] + params["b1"], 0.0)
    h2 = jnp.maximum(h1 @ params["w2"] + params["b2"], 0.0)
    return h2 @ params["w3"] + params["b3"]


if __name__ == "__main__":
    key = jax.random.PRNGKey(0)
    kx, kp, kx2 = jax.random.split(key, 3)

    input_size, num_classes = 32, 16
    params = init_params(kp, input_size, num_classes)

    fwd = jax.jit(functools.partial(multilabel_mlp_forward, batch_tile=2048))

    # Small demo batch (single full-extent block, no padding of any kind).
    batch = 8
    x = jax.random.normal(kx, (batch, input_size), jnp.float32)
    logits = jax.block_until_ready(fwd(x, params))
    ref = reference_forward(x, params)
    assert logits.shape == (batch, num_classes)
    assert jnp.allclose(logits, ref, atol=1e-2, rtol=1e-2), float(
        jnp.max(jnp.abs(logits - ref)))

    # Larger, non-tile-aligned batch exercises the multi-step grid with an
    # edge block (4 steps of 256 rows, last tile partially out of range).
    batch2 = 1000
    x2 = jax.random.normal(kx2, (batch2, input_size), jnp.float32)
    logits2 = jax.block_until_ready(fwd(x2, params))
    ref2 = reference_forward(x2, params)
    assert logits2.shape == (batch2, num_classes)
    assert jnp.allclose(logits2, ref2, atol=1e-2, rtol=1e-2), float(
        jnp.max(jnp.abs(logits2 - ref2)))

    print("KERNEL_OK")
</pallas_src>

<mosaic_0001>
module attributes {stable_mosaic.version = 11 : i64} {
  func.func @_mlp_kernel(%arg0: i32, %arg1: memref<8x32xf32, #tpu.memory_space<vmem>>, %arg2: memref<32x128xbf16, #tpu.memory_space<vmem>>, %arg3: memref<1x128xf32, #tpu.memory_space<vmem>>, %arg4: memref<128x64xbf16, #tpu.memory_space<vmem>>, %arg5: memref<1x64xf32, #tpu.memory_space<vmem>>, %arg6: memref<64x16xbf16, #tpu.memory_space<vmem>>, %arg7: memref<1x16xf32, #tpu.memory_space<vmem>>, %arg8: memref<8x16xf32, #tpu.memory_space<vmem>>) attributes {dimension_semantics = [#tpu.dimension_semantics<parallel>], iteration_bounds = array<i64: 1>, scalar_prefetch = 0 : i64, scratch_operands = 0 : i64, tpu.core_type = #tpu.core_type<tc>, window_params = [{transform_indices = @transform_0, window_bounds = array<i64: 8, 32>}, {pipeline_mode = #tpu.pipeline_mode<synchronous>, transform_indices = @transform_1, window_bounds = array<i64: 32, 128>}, {pipeline_mode = #tpu.pipeline_mode<synchronous>, transform_indices = @transform_2, window_bounds = array<i64: 1, 128>}, {pipeline_mode = #tpu.pipeline_mode<synchronous>, transform_indices = @transform_3, window_bounds = array<i64: 128, 64>}, {pipeline_mode = #tpu.pipeline_mode<synchronous>, transform_indices = @transform_4, window_bounds = array<i64: 1, 64>}, {pipeline_mode = #tpu.pipeline_mode<synchronous>, transform_indices = @transform_5, window_bounds = array<i64: 64, 16>}, {pipeline_mode = #tpu.pipeline_mode<synchronous>, transform_indices = @transform_6, window_bounds = array<i64: 1, 16>}, {transform_indices = @transform_7, window_bounds = array<i64: 8, 16>}]} {
    %c0 = arith.constant 0 : index
    %c0_0 = arith.constant 0 : index
    %0 = vector.load %arg1[%c0, %c0_0] : memref<8x32xf32, #tpu.memory_space<vmem>>, vector<8x32xf32>
    %1 = arith.truncf %0 : vector<8x32xf32> to vector<8x32xbf16>
    %c0_1 = arith.constant 0 : index
    %c0_2 = arith.constant 0 : index
    %2 = vector.load %arg2[%c0_1, %c0_2] : memref<32x128xbf16, #tpu.memory_space<vmem>>, vector<32x128xbf16>
    %cst = arith.constant dense<0.000000e+00> : vector<8x128xf32>
    %3 = tpu.matmul %1, %2, %cst {dimension_numbers = #tpu.dot_dimension_numbers<[1], [0], [0], [1], [0, 0, 1, 1], [], []>} : vector<8x32xbf16>, vector<32x128xbf16>, vector<8x128xf32> -> vector<8x128xf32>
    %c0_3 = arith.constant 0 : index
    %c0_4 = arith.constant 0 : index
    %4 = vector.load %arg3[%c0_3, %c0_4] : memref<1x128xf32, #tpu.memory_space<vmem>>, vector<1x128xf32>
    %5 = vector.broadcast %4 : vector<1x128xf32> to vector<8x128xf32>
    %6 = arith.addf %3, %5 : vector<8x128xf32>
    %cst_5 = arith.constant 0.000000e+00 : f32
    %7 = vector.broadcast %cst_5 : f32 to vector<8x128xf32>
    %8 = arith.maximumf %6, %7 : vector<8x128xf32>
    %9 = arith.truncf %8 : vector<8x128xf32> to vector<8x128xbf16>
    %c0_6 = arith.constant 0 : index
    %c0_7 = arith.constant 0 : index
    %10 = vector.load %arg4[%c0_6, %c0_7] : memref<128x64xbf16, #tpu.memory_space<vmem>>, vector<128x64xbf16>
    %cst_8 = arith.constant dense<0.000000e+00> : vector<8x64xf32>
    %11 = tpu.matmul %9, %10, %cst_8 {dimension_numbers = #tpu.dot_dimension_numbers<[1], [0], [0], [1], [0, 0, 1, 1], [], []>} : vector<8x128xbf16>, vector<128x64xbf16>, vector<8x64xf32> -> vector<8x64xf32>
    %c0_9 = arith.constant 0 : index
    %c0_10 = arith.constant 0 : index
    %12 = vector.load %arg5[%c0_9, %c0_10] : memref<1x64xf32, #tpu.memory_space<vmem>>, vector<1x64xf32>
    %13 = vector.broadcast %12 : vector<1x64xf32> to vector<8x64xf32>
    %14 = arith.addf %11, %13 : vector<8x64xf32>
    %cst_11 = arith.constant 0.000000e+00 : f32
    %15 = vector.broadcast %cst_11 : f32 to vector<8x64xf32>
    %16 = arith.maximumf %14, %15 : vector<8x64xf32>
    %17 = arith.truncf %16 : vector<8x64xf32> to vector<8x64xbf16>
    %c0_12 = arith.constant 0 : index
    %c0_13 = arith.constant 0 : index
    %18 = vector.load %arg6[%c0_12, %c0_13] : memref<64x16xbf16, #tpu.memory_space<vmem>>, vector<64x16xbf16>
    %cst_14 = arith.constant dense<0.000000e+00> : vector<8x16xf32>
    %19 = tpu.matmul %17, %18, %cst_14 {dimension_numbers = #tpu.dot_dimension_numbers<[1], [0], [0], [1], [0, 0, 1, 1], [], []>} : vector<8x64xbf16>, vector<64x16xbf16>, vector<8x16xf32> -> vector<8x16xf32>
    %c0_15 = arith.constant 0 : index
    %c0_16 = arith.constant 0 : index
    %20 = vector.load %arg7[%c0_15, %c0_16] : memref<1x16xf32, #tpu.memory_space<vmem>>, vector<1x16xf32>
    %21 = vector.broadcast %20 : vector<1x16xf32> to vector<8x16xf32>
    %22 = arith.addf %19, %21 : vector<8x16xf32>
    %c0_17 = arith.constant 0 : index
    %c0_18 = arith.constant 0 : index
    %23 = vector.load %arg8[%c0_17, %c0_18] : memref<8x16xf32, #tpu.memory_space<vmem>>, vector<8x16xf32>
    tpu.vector_store %arg8[%c0_17, %c0_18], %22 {strides = array<i32>} : memref<8x16xf32, #tpu.memory_space<vmem>>, vector<8x16xf32>,
    return
  }
  func.func @transform_0(%arg0: i32) -> (i32, i32) {
    %c0_i32 = arith.constant 0 : i32
    %c0_i32_0 = arith.constant 0 : i32
    return %arg0, %c0_i32 : i32, i32
  }
  func.func @transform_1(%arg0: i32) -> (i32, i32) {
    %c0_i32 = arith.constant 0 : i32
    %c0_i32_0 = arith.constant 0 : i32
    %c0_i32_1 = arith.constant 0 : i32
    return %c0_i32, %c0_i32_0 : i32, i32
  }
  func.func @transform_2(%arg0: i32) -> (i32, i32) {
    %c0_i32 = arith.constant 0 : i32
    %c0_i32_0 = arith.constant 0 : i32
    %c0_i32_1 = arith.constant 0 : i32
    return %c0_i32, %c0_i32_0 : i32, i32
  }
  func.func @transform_3(%arg0: i32) -> (i32, i32) {
    %c0_i32 = arith.constant 0 : i32
    %c0_i32_0 = arith.constant 0 : i32
    %c0_i32_1 = arith.constant 0 : i32
    return %c0_i32, %c0_i32_0 : i32, i32
  }
  func.func @transform_4(%arg0: i32) -> (i32, i32) {
    %c0_i32 = arith.constant 0 : i32
    %c0_i32_0 = arith.constant 0 : i32
    %c0_i32_1 = arith.constant 0 : i32
    return %c0_i32, %c0_i32_0 : i32, i32
  }
  func.func @transform_5(%arg0: i32) -> (i32, i32) {
    %c0_i32 = arith.constant 0 : i32
    %c0_i32_0 = arith.constant 0 : i32
    %c0_i32_1 = arith.constant 0 : i32
    return %c0_i32, %c0_i32_0 : i32, i32
  }
  func.func @transform_6(%arg0: i32) -> (i32, i32) {
    %c0_i32 = arith.constant 0 : i32
    %c0_i32_0 = arith.constant 0 : i32
    %c0_i32_1 = arith.constant 0 : i32
    return %c0_i32, %c0_i32_0 : i32, i32
  }
  func.func @transform_7(%arg0: i32) -> (i32, i32) {
    %c0_i32 = arith.constant 0 : i32
    %c0_i32_0 = arith.constant 0 : i32
    return %arg0, %c0_i32 : i32, i32
  }
}

</mosaic_0001>

<bundles_post_ra>
// kernel: multilabel_mlp_forward.1
= control target key start
LH: loop header
LB: loop body
LE: loop exit
PB: predicated region body
PF: predicated region fallthrough
CT: control target
= control target key end

     0   :  { %s423_s0 = inlined_call_operand.vmem [shape: f32[8,32], index: 0, kind: input, shape index: {}]   ;;  %s424_s1 = inlined_call_operand.vmem [shape: bf16[32,128], index: 1, kind: input, shape index: {}]   ;;  %s425_s2 = inlined_call_operand.vmem [shape: f32[1,128], index: 2, kind: input, shape index: {}]   ;;  %s426_s3 = inlined_call_operand.vmem [shape: bf16[128,64], index: 3, kind: input, shape index: {}]   ;;  %s427_s4 = inlined_call_operand.vmem [shape: f32[1,64], index: 4, kind: input, shape index: {}]   ;;  %s428_s5 = inlined_call_operand.vmem [shape: bf16[64,16], index: 5, kind: input, shape index: {}]   ;;  %s429_s6 = inlined_call_operand.vmem [shape: f32[1,16], index: 6, kind: input, shape index: {}]   ;;  %s430_s7 = inlined_call_operand.hbm [shape: f32[8,16], index: 7, kind: output, shape index: {}]  }
   0x1   :  { %v282_v0 = vld [vmem:[%s424_s1 + $0x8] sm:$0xff]  ;;  %v290_v1 = vld [vmem:[%s426_s3 + $0x38] sm:$0xff]  ;;  %v281_v2 = vld [vmem:[%s424_s1] sm:$0xff] }
   0x2   :  { %60 = vmatpush.bf16.msra.mxu0 %v282_v0  ;;  %v28_v3 = vld [vmem:[%s423_s0] sm:$0xff]  ;;  %137 = vmatpush.bf16.msra.mxu1 %v290_v1  ;;  %v289_v4 = vld [vmem:[%s426_s3 + $0x30] sm:$0xff] }
   0x3   :  { %12 = vsyncpa [#allocation3], 0  ;;  %v29_v5 = vpack.c.bf16 %v28_v3, %v28_v3  ;;  %vm50_vm0 = vcmask 261120   ;;  %v288_v6 = vld [vmem:[%s426_s3 + $0x28] sm:$0xff]  ;;  %v287_v7 = vld [vmem:[%s426_s3 + $0x20] sm:$0xff]  ;;  %vm188_vm1 = vcmask 523264  }
   0x4   :  { %v286_v8 = vld [vmem:[%s426_s3 + $0x18] sm:$0xff]  ;;  %v285_v9 = vld [vmem:[%s426_s3 + $0x10] sm:$0xff]  ;;  %v284_v10 = vld [vmem:[%s426_s3 + $0x8] sm:$0xff]  ;;  %s325_s10 = smov [#allocation2]   ;;  %s214_s1 = sshll.u32 %s430_s7, 4  ;;  %vm205_vm2 = vcmask 130048   ;;  %s215_s1 = int_to_ptr.hbm [resolvable:$true] %s214_s1 }
   0x5   :  { %v283_v11 = vld [vmem:[%s426_s3] sm:$0xff]  ;;  %v294_v12 = vld [vmem:[%s428_s5 + $0x18] sm:$0xff]  ;;  %v293_v13 = vld [vmem:[%s428_s5 + $0x10] sm:$0xff]  ;;  %s212_s11 = sshll.u32 %s325_s10, 4  ;;  %s213_s11 = int_to_ptr.vmem [resolvable:$true] %s212_s11 }
   0x6   :  { %61 = vmatpush.bf16.msra.mxu0 %v281_v2  ;;  %138 = vmatpush.bf16.msra.mxu1 %v289_v4  ;;  %v296_v14 = vld [vmem:[%s425_s2] ss:$0 sm:$0xff]  ;;  %v292_v20 = vld [vmem:[%s428_s5 + $0x8] sm:$0xff] }
   0x7   :  { %196 = vmatpush.bf16.msra.mxu2 %v294_v12  ;;  %v291_v21 = vld [vmem:[%s428_s5] sm:$0xff] }
   0x8   :  { %v297_v22 = vld [vmem:[%s427_s4] ss:$0 sm:$0xff] }
   0x9   :  { %231 = vmatmul.msk.bf16.vlgmr.msra.gmra.mxu0 %vm50_vm0, %v29_v5  ;;  %v298_v28 = vld [vmem:[%s429_s6] ss:$0 sm:$0xff] }
   0xa   :  { %139 = vmatpush.bf16.msra.mxu1 %v288_v6 }
   0xb   :  { %197 = vmatpush.bf16.msra.mxu2 %v293_v13 }
   0xe   :  { %140 = vmatpush.bf16.msra.mxu1 %v287_v7 }
   0xf   :  { %198 = vmatpush.bf16.msra.mxu2 %v292_v20 }
  0x12   :  { %141 = vmatpush.bf16.msra.mxu1 %v286_v8 }
  0x13   :  { %199 = vmatpush.bf16.msra.mxu2 %v291_v21 }
  0x16   :  { %142 = vmatpush.bf16.msra.mxu1 %v285_v9 }
  0x1a   :  { %143 = vmatpush.bf16.msra.mxu1 %v284_v10 }
  0x1e   :  { %144 = vmatpush.bf16.msra.mxu1 %v283_v11 }
  0x86   :  { %v63_v15 = vpop.f32.mrf.mxu0 }
  0x87   :  { %v64_v16 = vadd.f32 %v296_v14, %v63_v15 }
  0x89   :  { %v67_v17 = vmax.f32 %v64_v16, 0.0 }
  0x8b   :  { %v68_v18 = vpack.c.bf16 %v67_v17, %v67_v17 }
  0x8d   :  { %145 = vmatmul.bf16.vlgmr.msra.gmra.mxu1 %v68_v18 }
  0x8e   :  { %v65_v19 = vpop.f32.mrf.mxu0 }
 0x10a   :  { %v146_v23 = vpop.f32.mrf.mxu1 }
 0x10b   :  { %v147_v24 = vadd.f32 %v297_v22, %v146_v23 }
 0x10d   :  { %v150_v25 = vmax.f32 %v147_v24, 0.0 }
 0x10f   :  { %v151_v26 = vpack.c.bf16 %v150_v25, %v150_v25 }
 0x111   :  { %280 = vmatmul.msk.bf16.vlgmr.msra.gmra.mxu2 %vm188_vm1, %v151_v26 }
 0x112   :  { %v148_v27 = vpop.f32.mrf.mxu1 }
 0x194   :  { %v201_v29 = vpop.f32.mrf.mxu2 }
 0x195   :  { %v202_v30 = vadd.f32 %v298_v28, %v201_v29 }
 0x197   :  { %206 = vst.msk [vmem:[#allocation2] sm:$0xff] %vm205_vm2, %v202_v30 }
 0x198   :  { %217 = dma.vmem_to_hbm [thread:$0]  %s213_s11, 128, %s215_s1, [#allocation3]  }
 0x19c   :  { %v203_v31 = vpop.f32.mrf.mxu2 }
 0x19d   :  { %323 = dma.done.wait [#allocation3], 128  }
 0x19e   :  { %324 = vsyncadd [#allocation3], 4294967168 }
 0x19f   :  { %222 = vsyncpa [#allocation3], 1 }

</bundles_post_ra>
